<compile_context>
chip_gen: v7x
topology: tpu7x:2x2x1
jax: 0.10.0
libtpu: 0.0.40
codegen_flags: <defaults>
</compile_context>

<pallas_src>
import functools

import jax
import jax.numpy as jnp
from jax.experimental import pallas as pl
from jax.experimental.pallas import tpu as pltpu


def _ceil_div(a, b):
    return -(-a // b)


def _round_up(a, b):
    return _ceil_div(a, b) * b


# ----------------------------- Pallas kernel ------------------------------ #
def _cnn1d_fused_kernel(x_ref, w0_ref, b0_ref, wr_ref, br_ref, o_ref, *,
                        dgroups, ksize, n_layers):
    """Fused forward pass of all CNN1D layers for one lane-packed batch block.

    x_ref : (C, N)             f32  compact input; batch segments of width L
                                    packed along lanes, zero-padded to N.
    w0_ref: (K, CD, 1)         f32  depthwise taps of the initial grouped conv.
    b0_ref: (CD, 1)            f32
    wr_ref: (n_sub, K, CD, CD) bf16 per-tap dense block-diagonal weights of the
                                    subsequent grouped convs.
    br_ref: (n_sub, CD, 1)     f32
    o_ref : (CD, N)            f32  stale-tail columns are trimmed in wrapper.

    Fixed-width "stale tail" scheme: valid output column j of a segment only
    ever reads columns j..j+K-1, which lie inside the still-valid prefix of
    the same segment; roll wrap-around and cross-segment reads land only in
    stale/padding columns that the wrapper discards.
    """
    n = x_ref.shape[1]
    cd = o_ref.shape[0]

    # In-kernel per-group row broadcast: layer-0 output channel o reads input
    # channel o // D.  Keeps the DMA'd input block D-times smaller.
    x = jnp.repeat(x_ref[...], dgroups, axis=0)             # (CD, N) f32

    # ---- layer 0: depthwise conv = K VPU FMAs on rolled operands ----------
    w0 = w0_ref[...]                                        # (K, CD, 1)
    acc = jnp.broadcast_to(b0_ref[...], (cd, n))            # bias-init acc
    for k in range(ksize):                                  # K static -> unrolled
        xs = x if k == 0 else pltpu.roll(x, shift=n - k, axis=1)   # lane shift-left by k
        acc = acc + w0[k] * xs                              # (CD,1) lane-bcast FMA
    act = acc

    # ---- layers 1..NL-1: K accumulating (CD,CD)@(CD,N) MXU dots each ------
    for li in range(n_layers - 1):
        acc = jnp.broadcast_to(br_ref[li], (cd, n))
        for k in range(ksize):
            a_s = act if k == 0 else pltpu.roll(act, shift=n - k, axis=1)
            acc = acc + jnp.dot(wr_ref[li, k], a_s.astype(jnp.bfloat16),
                                preferred_element_type=jnp.float32)
        act = acc

    o_ref[...] = act


# ------------------------------ JAX glue ---------------------------------- #
def expand_grouped_weight_taps(w, groups):
    """PyTorch grouped Conv1d weight (O, I_per_group, K) -> per-tap dense
    (K, O, I_total) block-diagonal weights (PyTorch contiguous-group layout)."""
    O, Ipg, K = w.shape
    out_per_g = O // groups
    I_total = Ipg * groups
    dense = jnp.zeros((K, O, I_total), dtype=w.dtype)
    for g in range(groups):
        o_sl = slice(g * out_per_g, (g + 1) * out_per_g)
        i_sl = slice(g * Ipg, (g + 1) * Ipg)
        # (out_per_g, Ipg, K) -> (K, out_per_g, Ipg)
        dense = dense.at[:, o_sl, i_sl].set(jnp.transpose(w[o_sl], (2, 0, 1)))
    return dense


class CNN1DPallas:
    """Mirrors the PyTorch CNN1D forward (eval mode: Dropout = identity)."""

    def __init__(self, sequence_length, convolution_dimension_length,
                 kernel_size, n_1d_cnn_layers, n_channels=8, dropout=0.1,
                 key=None):
        assert n_1d_cnn_layers >= 1
        self.C = n_channels
        self.D = convolution_dimension_length
        self.K = kernel_size
        self.L = sequence_length
        self.n_layers = n_1d_cnn_layers
        self.CD = self.C * self.D
        CD, K = self.CD, self.K

        key = jax.random.PRNGKey(0) if key is None else key
        keys = jax.random.split(key, 2 * n_1d_cnn_layers)

        # initial_conv: Conv1d(C, C*D, K, groups=C) -> weight (CD, 1, K)
        self.w0 = 0.1 * jax.random.normal(keys[0], (CD, 1, K), jnp.float32)
        self.b0 = 0.01 * jax.random.normal(keys[1], (CD,), jnp.float32)
        self.w0_taps = jnp.transpose(self.w0, (2, 0, 1))       # (K, CD, 1)
        self.b0_col = self.b0.reshape(CD, 1)

        # subsequent convs: Conv1d(CD, CD, K, groups=D) -> weight (CD, C, K)
        self.ws, self.bs = [], []
        taps, bcols = [], []
        for i in range(1, n_1d_cnn_layers):
            wi = 0.1 * jax.random.normal(keys[2 * i], (CD, self.C, K),
                                         jnp.float32)
            bi = 0.01 * jax.random.normal(keys[2 * i + 1], (CD,), jnp.float32)
            self.ws.append(wi)
            self.bs.append(bi)
            taps.append(expand_grouped_weight_taps(wi, groups=self.D))
            bcols.append(bi.reshape(CD, 1))
        if taps:
            self.w_stack = jnp.stack(taps).astype(jnp.bfloat16)  # (NL-1,K,CD,CD)
            self.b_stack = jnp.stack(bcols)                      # (NL-1,CD,1)
        else:
            # NL == 1: tiny dummy stack keeps the kernel signature fixed
            # (dead DMA of a few KB; harmless).
            self.w_stack = jnp.zeros((1, K, CD, CD), jnp.bfloat16)
            self.b_stack = jnp.zeros((1, CD, 1), jnp.float32)

    def __call__(self, x):
        # x: (B, C, L)
        B, C, L = x.shape
        assert C == self.C and L == self.L
        CD, D, K, NL = self.CD, self.D, self.K, self.n_layers
        L_final = L - NL * (K - 1)
        assert L_final > 0

        # ---- lane-dense batch packing ------------------------------------
        # Pack `bpb` batch segments (fixed width L each) per grid block and
        # pad the block lane width to a multiple of 128 (>=256 lanes targeted
        # per MXU dot on v6e/v7x).
        target_lanes = 256
        bpb = max(1, min(B, _ceil_div(target_lanes, L)))
        num_blocks = _ceil_div(B, bpb)
        B_pad = num_blocks * bpb
        block_lanes = _round_up(bpb * L, 128)
        total_lanes = num_blocks * block_lanes

        xf = x.astype(jnp.float32)
        if B_pad > B:
            xf = jnp.pad(xf, ((0, B_pad - B), (0, 0), (0, 0)))
        xb = (xf.reshape(num_blocks, bpb, C, L)
                .transpose(0, 2, 1, 3)
                .reshape(num_blocks, C, bpb * L))
        if block_lanes > bpb * L:
            xb = jnp.pad(xb, ((0, 0), (0, 0), (0, block_lanes - bpb * L)))
        x_flat = xb.transpose(1, 0, 2).reshape(C, total_lanes)   # (C, total)

        n_sub = self.w_stack.shape[0]
        kernel = functools.partial(_cnn1d_fused_kernel, dgroups=D, ksize=K,
                                   n_layers=NL)

        # Advisory cost estimate (performed MACs incl. structural zeros).
        flops = int(2 * CD * K * total_lanes
                    + (NL - 1) * 2 * CD * CD * K * total_lanes)
        bytes_accessed = int(x_flat.size * 4 + self.w0_taps.size * 4
                             + self.b0_col.size * 4 + self.w_stack.size * 2
                             + self.b_stack.size * 4 + CD * total_lanes * 4)

        out_flat = pl.pallas_call(
            kernel,
            out_shape=jax.ShapeDtypeStruct((CD, total_lanes), jnp.float32),
            grid=(num_blocks,),
            in_specs=[
                pl.BlockSpec((C, block_lanes), lambda g: (0, g)),
                # TODO(synk): once grid > 1 in production, single-buffer these
                # constant-index weight blocks (pipeline_mode=pl.Buffered(1))
                # or hoist them into a one-time DMA to halve their VMEM cost.
                pl.BlockSpec((K, CD, 1), lambda g: (0, 0, 0)),
                pl.BlockSpec((CD, 1), lambda g: (0, 0)),
                pl.BlockSpec((n_sub, K, CD, CD), lambda g: (0, 0, 0, 0)),
                pl.BlockSpec((n_sub, CD, 1), lambda g: (0, 0, 0)),
            ],
            out_specs=pl.BlockSpec((CD, block_lanes), lambda g: (0, g)),
            compiler_params=pltpu.CompilerParams(
                dimension_semantics=("parallel",),
                vmem_limit_bytes=32 * 1024 * 1024),
            cost_estimate=pl.CostEstimate(flops=flops, transcendentals=0,
                                          bytes_accessed=bytes_accessed),
        )(x_flat, self.w0_taps, self.b0_col, self.w_stack, self.b_stack)

        # ---- trim stale tails / padding, restore (B, C, L_final, D) -------
        out = out_flat.reshape(CD, num_blocks, block_lanes)[:, :, :bpb * L]
        out = out.reshape(CD, num_blocks, bpb, L)[..., :L_final]
        out = out.reshape(CD, B_pad, L_final)[:, :B]
        out = out.transpose(1, 0, 2).reshape(B, self.C, D, L_final)
        return out.transpose(0, 1, 3, 2)                     # (B, C, Lf, D)


# --------------------------- reference (pure JAX) -------------------------- #
def _ref_forward(model, x):
    """Layer-by-layer grouped conv reference, mimicking the kernel's bf16
    weight/activation rounding for layers >= 1 so the comparison is tight.
    (Deliberate ~1e-3-level fidelity difference vs. the pure-f32 PyTorch CNN1D;
    accumulation stays f32.)"""
    B, C, L = x.shape
    D, K, NL, CD = model.D, model.K, model.n_layers, model.CD
    hp = jax.lax.Precision.HIGHEST
    out = jax.lax.conv_general_dilated(
        x.astype(jnp.float32), model.w0, (1,), "VALID",
        dimension_numbers=("NCH", "OIH", "NCH"),
        feature_group_count=C, precision=hp) + model.b0.reshape(1, CD, 1)
    for wi, bi in zip(model.ws, model.bs):
        out_q = out.astype(jnp.bfloat16).astype(jnp.float32)
        w_q = wi.astype(jnp.bfloat16).astype(jnp.float32)
        out = jax.lax.conv_general_dilated(
            out_q, w_q, (1,), "VALID",
            dimension_numbers=("NCH", "OIH", "NCH"),
            feature_group_count=D, precision=hp) + bi.reshape(1, CD, 1)
    L_final = L - NL * (K - 1)
    return jnp.transpose(out.reshape(B, C, D, L_final), (0, 1, 3, 2))


if __name__ == "__main__":
    # Small shapes: batch=2, n_channels=8, conv_dim=8, kernel=3, 2 layers, seq=16
    B, C, D, K, NL, L = 2, 8, 8, 3, 2, 16
    key = jax.random.PRNGKey(0)
    k_x, k_p = jax.random.split(key)
    x = jax.random.normal(k_x, (B, C, L), jnp.float32)

    model = CNN1DPallas(sequence_length=L, convolution_dimension_length=D,
                        kernel_size=K, n_1d_cnn_layers=NL, n_channels=C,
                        key=k_p)

    out = jax.block_until_ready(model(x))
    assert out.shape == (B, C, L - NL * (K - 1), D), out.shape

    ref = jax.block_until_ready(_ref_forward(model, x))
    err = float(jnp.max(jnp.abs(out - ref)))
    assert jnp.allclose(out, ref, atol=5e-3, rtol=5e-3), err

    print("KERNEL_OK")
</pallas_src>

<mosaic_0001>
module attributes {stable_mosaic.version = 11 : i64} {
  func.func @_cnn1d_fused_kernel(%arg0: i32, %arg1: memref<8x128xf32, #tpu.memory_space<vmem>>, %arg2: memref<3x64x1xf32, #tpu.memory_space<vmem>>, %arg3: memref<64x1xf32, #tpu.memory_space<vmem>>, %arg4: memref<1x3x64x64xbf16, #tpu.memory_space<vmem>>, %arg5: memref<1x64x1xf32, #tpu.memory_space<vmem>>, %arg6: memref<64x128xf32, #tpu.memory_space<vmem>>) attributes {dimension_semantics = [#tpu.dimension_semantics<parallel>], iteration_bounds = array<i64: 1>, scalar_prefetch = 0 : i64, scratch_operands = 0 : i64, tpu.core_type = #tpu.core_type<tc>, window_params = [{transform_indices = @transform_0, window_bounds = array<i64: 8, 128>}, {pipeline_mode = #tpu.pipeline_mode<synchronous>, transform_indices = @transform_1, window_bounds = array<i64: 3, 64, 1>}, {pipeline_mode = #tpu.pipeline_mode<synchronous>, transform_indices = @transform_2, window_bounds = array<i64: 64, 1>}, {pipeline_mode = #tpu.pipeline_mode<synchronous>, transform_indices = @transform_3, window_bounds = array<i64: 1, 3, 64, 64>}, {pipeline_mode = #tpu.pipeline_mode<synchronous>, transform_indices = @transform_4, window_bounds = array<i64: 1, 64, 1>}, {transform_indices = @transform_5, window_bounds = array<i64: 64, 128>}]} {
    %c0 = arith.constant 0 : index
    %c0_0 = arith.constant 0 : index
    %0 = vector.load %arg1[%c0, %c0_0] : memref<8x128xf32, #tpu.memory_space<vmem>>, vector<8x128xf32>
    %1 = vector.shape_cast %0 : vector<8x128xf32> to vector<8x1x128xf32>
    %2 = vector.broadcast %1 : vector<8x1x128xf32> to vector<8x8x128xf32>
    %3 = vector.shape_cast %2 : vector<8x8x128xf32> to vector<64x128xf32>
    %c0_1 = arith.constant 0 : index
    %c0_2 = arith.constant 0 : index
    %c0_3 = arith.constant 0 : index
    %4 = vector.load %arg2[%c0_1, %c0_2, %c0_3] : memref<3x64x1xf32, #tpu.memory_space<vmem>>, vector<3x64x1xf32>
    %c0_4 = arith.constant 0 : index
    %c0_5 = arith.constant 0 : index
    %5 = vector.load %arg3[%c0_4, %c0_5] : memref<64x1xf32, #tpu.memory_space<vmem>>, vector<64x1xf32>
    %6 = vector.shape_cast %5 : vector<64x1xf32> to vector<64x1xf32>
    %7 = vector.broadcast %6 : vector<64x1xf32> to vector<64x128xf32>
    %8 = vector.extract_strided_slice %4 {offsets = [0, 0, 0], sizes = [1, 64, 1], strides = [1, 1, 1]} : vector<3x64x1xf32> to vector<1x64x1xf32>
    %9 = vector.shape_cast %8 : vector<1x64x1xf32> to vector<64x1xf32>
    %10 = vector.broadcast %9 : vector<64x1xf32> to vector<64x128xf32>
    %11 = arith.mulf %10, %3 : vector<64x128xf32>
    %12 = arith.addf %7, %11 : vector<64x128xf32>
    %c127_i32 = arith.constant 127 : i32
    %13 = tpu.dynamic_rotate %3 by %c127_i32 dim 1 : vector<64x128xf32>, i32 -> vector<64x128xf32>
    %14 = vector.extract_strided_slice %4 {offsets = [1, 0, 0], sizes = [1, 64, 1], strides = [1, 1, 1]} : vector<3x64x1xf32> to vector<1x64x1xf32>
    %15 = vector.shape_cast %14 : vector<1x64x1xf32> to vector<64x1xf32>
    %16 = vector.broadcast %15 : vector<64x1xf32> to vector<64x128xf32>
    %17 = arith.mulf %16, %13 : vector<64x128xf32>
    %18 = arith.addf %12, %17 : vector<64x128xf32>
    %c126_i32 = arith.constant 126 : i32
    %19 = tpu.dynamic_rotate %3 by %c126_i32 dim 1 : vector<64x128xf32>, i32 -> vector<64x128xf32>
    %20 = vector.extract_strided_slice %4 {offsets = [2, 0, 0], sizes = [1, 64, 1], strides = [1, 1, 1]} : vector<3x64x1xf32> to vector<1x64x1xf32>
    %21 = vector.shape_cast %20 : vector<1x64x1xf32> to vector<64x1xf32>
    %22 = vector.broadcast %21 : vector<64x1xf32> to vector<64x128xf32>
    %23 = arith.mulf %22, %19 : vector<64x128xf32>
    %24 = arith.addf %18, %23 : vector<64x128xf32>
    %c0_6 = arith.constant 0 : index
    %c0_7 = arith.constant 0 : index
    %c0_8 = arith.constant 0 : index
    %25 = vector.load %arg5[%c0_6, %c0_7, %c0_8] : memref<1x64x1xf32, #tpu.memory_space<vmem>>, vector<1x64x1xf32>
    %26 = vector.shape_cast %25 : vector<1x64x1xf32> to vector<64x1xf32>
    %27 = vector.shape_cast %26 : vector<64x1xf32> to vector<64x1xf32>
    %28 = vector.broadcast %27 : vector<64x1xf32> to vector<64x128xf32>
    %c0_9 = arith.constant 0 : index
    %c0_10 = arith.constant 0 : index
    %c0_11 = arith.constant 0 : index
    %c0_12 = arith.constant 0 : index
    %29 = vector.load %arg4[%c0_9, %c0_10, %c0_11, %c0_12] : memref<1x3x64x64xbf16, #tpu.memory_space<vmem>>, vector<1x1x64x64xbf16>
    %30 = vector.shape_cast %29 : vector<1x1x64x64xbf16> to vector<64x64xbf16>
    %31 = arith.truncf %24 : vector<64x128xf32> to vector<64x128xbf16>
    %cst = arith.constant dense<0.000000e+00> : vector<64x128xf32>
    %32 = tpu.matmul %30, %31, %cst {dimension_numbers = #tpu.dot_dimension_numbers<[1], [0], [0], [1], [0, 0, 1, 1], [], []>} : vector<64x64xbf16>, vector<64x128xbf16>, vector<64x128xf32> -> vector<64x128xf32>
    %33 = arith.addf %28, %32 : vector<64x128xf32>
    %c127_i32_13 = arith.constant 127 : i32
    %34 = tpu.dynamic_rotate %24 by %c127_i32_13 dim 1 : vector<64x128xf32>, i32 -> vector<64x128xf32>
    %c0_14 = arith.constant 0 : index
    %c1 = arith.constant 1 : index
    %c0_15 = arith.constant 0 : index
    %c0_16 = arith.constant 0 : index
    %35 = vector.load %arg4[%c0_14, %c1, %c0_15, %c0_16] : memref<1x3x64x64xbf16, #tpu.memory_space<vmem>>, vector<1x1x64x64xbf16>
    %36 = vector.shape_cast %35 : vector<1x1x64x64xbf16> to vector<64x64xbf16>
    %37 = arith.truncf %34 : vector<64x128xf32> to vector<64x128xbf16>
    %cst_17 = arith.constant dense<0.000000e+00> : vector<64x128xf32>
    %38 = tpu.matmul %36, %37, %cst_17 {dimension_numbers = #tpu.dot_dimension_numbers<[1], [0], [0], [1], [0, 0, 1, 1], [], []>} : vector<64x64xbf16>, vector<64x128xbf16>, vector<64x128xf32> -> vector<64x128xf32>
    %39 = arith.addf %33, %38 : vector<64x128xf32>
    %c126_i32_18 = arith.constant 126 : i32
    %40 = tpu.dynamic_rotate %24 by %c126_i32_18 dim 1 : vector<64x128xf32>, i32 -> vector<64x128xf32>
    %c0_19 = arith.constant 0 : index
    %c2 = arith.constant 2 : index
    %c0_20 = arith.constant 0 : index
    %c0_21 = arith.constant 0 : index
    %41 = vector.load %arg4[%c0_19, %c2, %c0_20, %c0_21] : memref<1x3x64x64xbf16, #tpu.memory_space<vmem>>, vector<1x1x64x64xbf16>
    %42 = vector.shape_cast %41 : vector<1x1x64x64xbf16> to vector<64x64xbf16>
    %43 = arith.truncf %40 : vector<64x128xf32> to vector<64x128xbf16>
    %cst_22 = arith.constant dense<0.000000e+00> : vector<64x128xf32>
    %44 = tpu.matmul %42, %43, %cst_22 {dimension_numbers = #tpu.dot_dimension_numbers<[1], [0], [0], [1], [0, 0, 1, 1], [], []>} : vector<64x64xbf16>, vector<64x128xbf16>, vector<64x128xf32> -> vector<64x128xf32>
    %45 = arith.addf %39, %44 : vector<64x128xf32>
    %c0_23 = arith.constant 0 : index
    %c0_24 = arith.constant 0 : index
    %46 = vector.load %arg6[%c0_23, %c0_24] : memref<64x128xf32, #tpu.memory_space<vmem>>, vector<64x128xf32>
    tpu.vector_store %arg6[%c0_23, %c0_24], %45 {strides = array<i32>} : memref<64x128xf32, #tpu.memory_space<vmem>>, vector<64x128xf32>,
    return
  }
  func.func @transform_0(%arg0: i32) -> (i32, i32) {
    %c0_i32 = arith.constant 0 : i32
    %c0_i32_0 = arith.constant 0 : i32
    return %c0_i32, %arg0 : i32, i32
  }
  func.func @transform_1(%arg0: i32) -> (i32, i32, i32) {
    %c0_i32 = arith.constant 0 : i32
    %c0_i32_0 = arith.constant 0 : i32
    %c0_i32_1 = arith.constant 0 : i32
    %c0_i32_2 = arith.constant 0 : i32
    return %c0_i32, %c0_i32_0, %c0_i32_1 : i32, i32, i32
  }
  func.func @transform_2(%arg0: i32) -> (i32, i32) {
    %c0_i32 = arith.constant 0 : i32
    %c0_i32_0 = arith.constant 0 : i32
    %c0_i32_1 = arith.constant 0 : i32
    return %c0_i32, %c0_i32_0 : i32, i32
  }
  func.func @transform_3(%arg0: i32) -> (i32, i32, i32, i32) {
    %c0_i32 = arith.constant 0 : i32
    %c0_i32_0 = arith.constant 0 : i32
    %c0_i32_1 = arith.constant 0 : i32
    %c0_i32_2 = arith.constant 0 : i32
    %c0_i32_3 = arith.constant 0 : i32
    return %c0_i32, %c0_i32_0, %c0_i32_1, %c0_i32_2 : i32, i32, i32, i32
  }
  func.func @transform_4(%arg0: i32) -> (i32, i32, i32) {
    %c0_i32 = arith.constant 0 : i32
    %c0_i32_0 = arith.constant 0 : i32
    %c0_i32_1 = arith.constant 0 : i32
    %c0_i32_2 = arith.constant 0 : i32
    return %c0_i32, %c0_i32_0, %c0_i32_1 : i32, i32, i32
  }
  func.func @transform_5(%arg0: i32) -> (i32, i32) {
    %c0_i32 = arith.constant 0 : i32
    %c0_i32_0 = arith.constant 0 : i32
    return %c0_i32, %arg0 : i32, i32
  }
}

</mosaic_0001>

<bundles_post_ra>
// kernel: tpu_custom_call.1
= control target key start
LH: loop header
LB: loop body
LE: loop exit
PB: predicated region body
PF: predicated region fallthrough
CT: control target
= control target key end

     0   :  { %v1073_v2 = vmov 0   ;;  %v28_v5 = vlaneseq  ;;  %v1074_v10 = vmov 1966171168   ;;  %s1379_s0 = inlined_call_operand.vmem [shape: f32[8,128], index: 0, kind: input, shape index: {}]   ;;  %s1380_s1 = inlined_call_operand.vmem [shape: f32[3,64,1], index: 1, kind: input, shape index: {}]   ;;  %s1381_s2 = inlined_call_operand.vmem [shape: f32[64,1], index: 2, kind: input, shape index: {}]   ;;  %s1382_s3 = inlined_call_operand.vmem [shape: bf16[1,3,64,64], index: 3, kind: input, shape index: {}]   ;;  %s1383_s4 = inlined_call_operand.vmem [shape: f32[1,64,1], index: 4, kind: input, shape index: {}]   ;;  %s1384_s5 = inlined_call_operand.hbm [shape: f32[64,128], index: 5, kind: output, shape index: {}]  }
   0x1   :  { %v137_v0 = vld [vmem:[%s1381_s2] sm:$0xff]  ;;  %995 = vset.pattern.permute.xlu1 %v1073_v2  ;;  %994 = vset.pattern.permute.xlu0 %v1073_v2  ;;  %v138_v3 = vld [vmem:[%s1381_s2 + $0x8] sm:$0xff]  ;;  %v116_v8 = vld [vmem:[%s1380_s1 + $0x18] sm:$0xff]  ;;  %v26_v11 = vunpack.c.l.s4 %v1074_v10 }
   0x2   :  { %v113_v1 = vld [vmem:[%s1380_s1] sm:$0xff]  ;;  %147 = vperm.xlu1 %995, %v137_v0   ;;  %v114_v4 = vld [vmem:[%s1380_s1 + $0x8] sm:$0xff]  ;;  %v115_v9 = vld [vmem:[%s1380_s1 + $0x10] sm:$0xff]  ;;  %v29_v12 = vshrl.u32 %v28_v5, 7 }
   0x3   :  { %187 = vperm.xlu0 %994, %v113_v1   ;;  %v122_v6 = vld [vmem:[%s1380_s1 + $0x48] sm:$0xff]  ;;  %v121_v7 = vld [vmem:[%s1380_s1 + $0x40] sm:$0xff]  ;;  %v27_v15 = vunpack.c.0.s8 %v26_v11  ;;  %v140_v16 = vld [vmem:[%s1381_s2 + $0x18] sm:$0xff] }
   0x4   :  { %v130_v13 = vld [vmem:[%s1380_s1 + $0x88] sm:$0xff]  ;;  %v129_v14 = vld [vmem:[%s1380_s1 + $0x80] sm:$0xff]  ;;  %v139_v18 = vld [vmem:[%s1381_s2 + $0x10] sm:$0xff] }
   0x5   :  { %v1143_v17 = vsub.s32 %v27_v15, %v29_v12  ;;  %v22_v19 = vld [vmem:[%s1379_s0] sm:$0xff] }
   0x6   :  { %152 = vperm.xlu1 %995, %v138_v3  }
   0x7   :  { %192 = vperm.xlu0 %994, %v114_v4  }
   0xa   :  { %264 = vperm.xlu1 %995, %v122_v6  }
   0xb   :  { %259 = vperm.xlu0 %994, %v121_v7  }
   0xe   :  { %202 = vperm.xlu1 %995, %v116_v8  }
   0xf   :  { %197 = vperm.xlu0 %994, %v115_v9  }
  0x12   :  { %336 = vperm.xlu1 %995, %v130_v13  }
  0x13   :  { %331 = vperm.xlu0 %994, %v129_v14  }
  0x14   :  { %10 = vsyncpa [#allocation3], 0  ;;  %v31_v20 = vrot.slane %v22_v19, %v1143_v17  ;;  %v124_v21 = vld [vmem:[%s1380_s1 + $0x58] sm:$0xff]  ;;  %v123_v22 = vld [vmem:[%s1380_s1 + $0x50] sm:$0xff]  ;;  %v1165_v27 = vsub.s32 0, %v29_v12  ;;  %s1075_s30 = smov 127   ;;  %v24_v45 = vcombine.high %v22_v19, %v22_v19 }
  0x15   :  { %v118_v24 = vld [vmem:[%s1380_s1 + $0x28] sm:$0xff]  ;;  %v117_v25 = vld [vmem:[%s1380_s1 + $0x20] sm:$0xff]  ;;  %v132_v29 = vld [vmem:[%s1380_s1 + $0x98] sm:$0xff]  ;;  %s1076_s14 = smov 126   ;;  %vm465_vm0 = vcmask 523264  }
  0x16   :  { %162 = vperm.xlu1 %995, %v140_v16   ;;  %v39_v23 = vcombine.high %v31_v20, %v31_v20  ;;  %v47_v26 = vrot.slane %v31_v20, %v1143_v17  ;;  %v131_v30 = vld [vmem:[%s1380_s1 + $0x90] sm:$0xff]  ;;  %v141_v33 = vld [vmem:[%s1381_s2 + $0x20] sm:$0xff]  ;;  %v142_v34 = vld [vmem:[%s1381_s2 + $0x28] sm:$0xff]  ;;  %v38_v48 = vrot.slane %v24_v45, %v1143_v17 }
  0x17   :  { %157 = vperm.xlu0 %994, %v139_v18   ;;  %v125_v35 = vld [vmem:[%s1380_s1 + $0x60] sm:$0xff]  ;;  %v126_v36 = vld [vmem:[%s1380_s1 + $0x68] sm:$0xff]  ;;  %v119_v37 = vld [vmem:[%s1380_s1 + $0x30] sm:$0xff] }
  0x18   :  { %v61_v28 = vrot.slane %v39_v23, %v1143_v17  ;;  %v1175_v31 = vrot.slane %v47_v26, %v1165_v27  ;;  %v120_v38 = vld [vmem:[%s1380_s1 + $0x38] sm:$0xff]  ;;  %v69_v39 = vcombine.high %v47_v26, %v47_v26  ;;  %v133_v41 = vld [vmem:[%s1380_s1 + $0xa0] sm:$0xff]  ;;  %v134_v42 = vld [vmem:[%s1380_s1 + $0xa8] sm:$0xff]  ;;  %v40_v51 = vcombine.high %v38_v48, %v38_v48 }
  0x19   :  { %v143_v46 = vld [vmem:[%s1381_s2 + $0x30] sm:$0xff]  ;;  %v144_v47 = vld [vmem:[%s1381_s2 + $0x38] sm:$0xff]  ;;  %v54_v52 = vrot.slane %v38_v48, %v1143_v17  ;;  %v1037_v62 = vld [vmem:[%s1382_s3] sm:$0xff]  }
  0x1a   :  { %274 = vperm.xlu1 %995, %v124_v21   ;;  %v1178_v32 = vrot.slane %v61_v28, %v1165_v27  ;;  %v71_v40 = vcombine.high %v61_v28, %v61_v28  ;;  %v1213_v43 = vrot.slane %v69_v39, %v1165_v27  ;;  %v127_v49 = vld [vmem:[%s1380_s1 + $0x70] sm:$0xff]  ;;  %v128_v50 = vld [vmem:[%s1380_s1 + $0x78] sm:$0xff]  ;;  %v68_v53 = vrot.slane %v40_v51, %v1143_v17 }
  0x1b   :  { %269 = vperm.xlu0 %994, %v123_v22   ;;  %v135_v54 = vld [vmem:[%s1380_s1 + $0xb0] sm:$0xff]  ;;  %v136_v55 = vld [vmem:[%s1380_s1 + $0xb8] sm:$0xff]  ;;  %v1248_v56 = vrot.slane %v54_v52, %v1165_v27  ;;  %v70_v58 = vcombine.high %v54_v52, %v54_v52  ;;  %915 = vmatprep.mubr.msk.bf16.mxu1 %vm465_vm0, %v1037_v62 }
  0x1c   :  { %v1216_v44 = vrot.slane %v71_v40, %v1165_v27  ;;  %v1251_v57 = vrot.slane %v68_v53, %v1165_v27  ;;  %v72_v59 = vcombine.high %v68_v53, %v68_v53 }
  0x1d   :  { %v1262_v60 = vrot.slane %v70_v58, %v1165_v27 }
  0x1e   :  { %212 = vperm.xlu1 %995, %v118_v24   ;;  %v1265_v61 = vrot.slane %v72_v59, %v1165_v27 }
  0x1f   :  { %207 = vperm.xlu0 %994, %v117_v25  }
  0x22   :  { %346 = vperm.xlu1 %995, %v132_v29  }
  0x23   :  { %341 = vperm.xlu0 %994, %v131_v30  }
  0x26   :  { %243 = vrot.lane.b32.xlu1 %v1178_v32, %s1075_s30 }
  0x27   :  { %241 = vrot.lane.b32.xlu0 %v1175_v31, %s1075_s30 }
  0x2a   :  { %172 = vperm.xlu1 %995, %v142_v34  }
  0x2b   :  { %167 = vperm.xlu0 %994, %v141_v33  }
  0x2e   :  { %284 = vperm.xlu1 %995, %v126_v36  }
  0x2f   :  { %279 = vperm.xlu0 %994, %v125_v35  }
  0x32   :  { %315 = vrot.lane.b32.xlu1 %v1178_v32, %s1076_s14 }
  0x33   :  { %313 = vrot.lane.b32.xlu0 %v1175_v31, %s1076_s14 }
  0x36   :  { %222 = vperm.xlu1 %995, %v120_v38  }
  0x37   :  { %217 = vperm.xlu0 %994, %v119_v37  }
  0x3a   :  { %356 = vperm.xlu1 %995, %v134_v42  }
  0x3b   :  { %351 = vperm.xlu0 %994, %v133_v41  }
  0x3e   :  { %247 = vrot.lane.b32.xlu1 %v1216_v44, %s1075_s30 }
  0x3f   :  { %245 = vrot.lane.b32.xlu0 %v1213_v43, %s1075_s30 }
  0x42   :  { %182 = vperm.xlu1 %995, %v144_v47  }
  0x43   :  { %177 = vperm.xlu0 %994, %v143_v46  }
  0x46   :  { %294 = vperm.xlu1 %995, %v128_v50  }
  0x47   :  { %289 = vperm.xlu0 %994, %v127_v49  }
  0x4a   :  { %319 = vrot.lane.b32.xlu1 %v1216_v44, %s1076_s14 }
  0x4b   :  { %317 = vrot.lane.b32.xlu0 %v1213_v43, %s1076_s14 }
  0x4e   :  { %366 = vperm.xlu1 %995, %v136_v55  }
  0x4f   :  { %361 = vperm.xlu0 %994, %v135_v54  }
  0x52   :  { %251 = vrot.lane.b32.xlu1 %v1251_v57, %s1075_s30 }
  0x53   :  { %249 = vrot.lane.b32.xlu0 %v1248_v56, %s1075_s30 }
  0x56   :  { %323 = vrot.lane.b32.xlu1 %v1251_v57, %s1076_s14 }
  0x57   :  { %321 = vrot.lane.b32.xlu0 %v1248_v56, %s1076_s14 }
  0x5a   :  { %255 = vrot.lane.b32.xlu1 %v1265_v61, %s1075_s30 }
  0x5b   :  { %253 = vrot.lane.b32.xlu0 %v1262_v60, %s1075_s30 }
  0x5e   :  { %327 = vrot.lane.b32.xlu1 %v1265_v61, %s1076_s14 }
  0x5f   :  { %325 = vrot.lane.b32.xlu0 %v1262_v60, %s1076_s14 }
  0x81   :  { %v148_v63 = vpop.permute.xlu1 %147 }
  0x82   :  { %v188_v0 = vpop.permute.xlu0 %187 }
  0x83   :  { %v225_v21 = vmul.f32 %v188_v0, %v1175_v31 }
  0x85   :  { %v153_v1 = vpop.permute.xlu1 %152  ;;  %v233_v27 = vadd.f32 %v225_v21, %v148_v63 }
  0x86   :  { %v193_v2 = vpop.permute.xlu0 %192 }
  0x87   :  { %v226_v22 = vmul.f32 %v193_v2, %v1178_v32 }
  0x89   :  { %v265_v3 = vpop.permute.xlu1 %264  ;;  %v234_v28 = vadd.f32 %v226_v22, %v153_v1 }
  0x8a   :  { %v260_v4 = vpop.permute.xlu0 %259 }
  0x8d   :  { %v203_v5 = vpop.permute.xlu1 %202 }
  0x8e   :  { %v198_v6 = vpop.permute.xlu0 %197  ;;  %v228_v51 = vmul.f32 %v203_v5, %v1216_v44 }
  0x8f   :  { %v227_v52 = vmul.f32 %v198_v6, %v1213_v43 }
  0x91   :  { %v337_v7 = vpop.permute.xlu1 %336 }
  0x92   :  { %v332_v8 = vpop.permute.xlu0 %331 }
  0x95   :  { %v163_v9 = vpop.permute.xlu1 %162 }
  0x96   :  { %v158_v10 = vpop.permute.xlu0 %157  ;;  %v236_v55 = vadd.f32 %v228_v51, %v163_v9  ;;  %v392_v51 = vld [vmem:[%s1383_s4 + $0x38] sm:$0xff] }
  0x97   :  { %v235_v58 = vadd.f32 %v227_v52, %v158_v10  ;;  %v386_v52 = vld [vmem:[%s1383_s4 + $0x8] sm:$0xff] }
  0x99   :  { %v275_v11 = vpop.permute.xlu1 %274 }
  0x9a   :  { %v270_v12 = vpop.permute.xlu0 %269 }
  0x9d   :  { %v213_v13 = vpop.permute.xlu1 %212 }
  0x9e   :  { %v208_v14 = vpop.permute.xlu0 %207  ;;  %v230_v5 = vmul.f32 %v213_v13, %v1251_v57 }
  0x9f   :  { %v229_v6 = vmul.f32 %v208_v14, %v1248_v56 }
  0xa1   :  { %v347_v15 = vpop.permute.xlu1 %346 }
  0xa2   :  { %v342_v16 = vpop.permute.xlu0 %341 }
  0xa5   :  { %v244_v18 = vpop.permute.xlu1 %243 }
  0xa6   :  { %v242_v17 = vpop.permute.xlu0 %241  ;;  %v298_v26 = vmul.f32 %v265_v3, %v244_v18 }
  0xa7   :  { %v297_v25 = vmul.f32 %v260_v4, %v242_v17 }
  0xa8   :  { %v306_v34 = vadd.f32 %v298_v26, %v234_v28 }
  0xa9   :  { %v173_v20 = vpop.permute.xlu1 %172  ;;  %v305_v33 = vadd.f32 %v297_v25, %v233_v27 }
  0xaa   :  { %v168_v19 = vpop.permute.xlu0 %167 }
  0xad   :  { %v285_v24 = vpop.permute.xlu1 %284 }
  0xae   :  { %v280_v23 = vpop.permute.xlu0 %279 }
  0xb1   :  { %v316_v30 = vpop.permute.xlu1 %315 }
  0xb2   :  { %v314_v29 = vpop.permute.xlu0 %313  ;;  %v370_v36 = vmul.f32 %v337_v7, %v316_v30 }
  0xb3   :  { %v369_v35 = vmul.f32 %v332_v8, %v314_v29 }
  0xb4   :  { %v378_v38 = vadd.f32 %v370_v36, %v306_v34 }
  0xb5   :  { %v377_v37 = vadd.f32 %v369_v35, %v305_v33  ;;  %v223_v40 = vpop.permute.xlu1 %222 }
  0xb6   :  { %v218_v39 = vpop.permute.xlu0 %217  ;;  %v232_v30 = vmul.f32 %v223_v40, %v1265_v61 }
  0xb7   :  { %v441_v41 = vpack.c.bf16 %v378_v38, %v377_v37  ;;  %v1281_v31 = vpack.i.bf16 %v378_v38, %v377_v37  ;;  %v231_v29 = vmul.f32 %v218_v39, %v1262_v60  ;;  %v1041_v60 = vld [vmem:[%s1382_s3 + $0x20] sm:$0xff]  }
  0xb8   :  { %931 = vmatprep.mubr.msk.bf16.mxu0 %vm465_vm0, %v1041_v60 }
  0xb9   :  { %907 = vmatprep.subr.bf16.mxu1 %v441_v41  ;;  %997 = vrot.lane.b32.xlu0 %v1281_v31, %s1075_s30  ;;  %v357_v42 = vpop.permute.xlu1 %356 }
  0xba   :  { %v352_v32 = vpop.permute.xlu0 %351  ;;  %908 = vmatpush3.bf16.msra.mxu1 %v441_v41 }
  0xbd   :  { %v248_v46 = vpop.permute.xlu1 %247 }
  0xbe   :  { %v246_v45 = vpop.permute.xlu0 %245  ;;  %v300_v54 = vmul.f32 %v275_v11, %v248_v46  ;;  %v237_v11 = vadd.f32 %v229_v6, %v168_v19  ;;  %v385_v46 = vld [vmem:[%s1383_s4] sm:$0xff] }
  0xbf   :  { %v299_v53 = vmul.f32 %v270_v12, %v246_v45  ;;  %v238_v12 = vadd.f32 %v230_v5, %v173_v20  ;;  %v391_v45 = vld [vmem:[%s1383_s4 + $0x30] sm:$0xff] }
  0xc0   :  { %v308_v0 = vadd.f32 %v300_v54, %v236_v55 }
  0xc1   :  { %v183_v48 = vpop.permute.xlu1 %182  ;;  %v307_v63 = vadd.f32 %v299_v53, %v235_v58  ;;  %v388_v53 = vld [vmem:[%s1383_s4 + $0x18] sm:$0xff] }
  0xc2   :  { %v178_v47 = vpop.permute.xlu0 %177  ;;  %v240_v20 = vadd.f32 %v232_v30, %v183_v48  ;;  %v1040_v48 = vld [vmem:[%s1382_s3 + $0x18] sm:$0xff]  }
  0xc3   :  { %v239_v19 = vadd.f32 %v231_v29, %v178_v47  ;;  %v390_v47 = vld [vmem:[%s1383_s4 + $0x28] sm:$0xff] }
  0xc5   :  { %v295_v50 = vpop.permute.xlu1 %294 }
  0xc6   :  { %v290_v49 = vpop.permute.xlu0 %289 }
  0xc9   :  { %v320_v62 = vpop.permute.xlu1 %319 }
  0xca   :  { %v318_v59 = vpop.permute.xlu0 %317  ;;  %v372_v2 = vmul.f32 %v347_v15, %v320_v62 }
  0xcb   :  { %v371_v1 = vmul.f32 %v342_v16, %v318_v59 }
  0xcc   :  { %v380_v4 = vadd.f32 %v372_v2, %v308_v0 }
  0xcd   :  { %v379_v3 = vadd.f32 %v371_v1, %v307_v63  ;;  %v367_v8 = vpop.permute.xlu1 %366 }
  0xce   :  { %v362_v7 = vpop.permute.xlu0 %361 }
  0xcf   :  { %v442_v17 = vpack.c.bf16 %v380_v4, %v379_v3  ;;  %v1001_v18 = vpack.i.bf16 %v380_v4, %v379_v3 }
  0xd1   :  { %909 = vmatprep.subr.bf16.mxu1 %v442_v17  ;;  %1002 = vrot.lane.b32.xlu1 %v1001_v18, %s1075_s30  ;;  %v252_v44 = vpop.permute.xlu1 %251 }
  0xd2   :  { %910 = vmatpush3.bf16.msra.mxu1 %v442_v17  ;;  %v250_v43 = vpop.permute.xlu0 %249  ;;  %v302_v10 = vmul.f32 %v285_v24, %v252_v44 }
  0xd3   :  { %v301_v9 = vmul.f32 %v280_v23, %v250_v43 }
  0xd4   :  { %v310_v22 = vadd.f32 %v302_v10, %v238_v12 }
  0xd5   :  { %v324_v16 = vpop.permute.xlu1 %323  ;;  %v309_v21 = vadd.f32 %v301_v9, %v237_v11 }
  0xd6   :  { %v322_v15 = vpop.permute.xlu0 %321  ;;  %v374_v26 = vmul.f32 %v357_v42, %v324_v16  ;;  %v1038_v42 = vld [vmem:[%s1382_s3 + $0x8] sm:$0xff]  }
  0xd7   :  { %v373_v25 = vmul.f32 %v352_v32, %v322_v15  ;;  %v389_v32 = vld [vmem:[%s1383_s4 + $0x20] sm:$0xff] }
  0xd8   :  { %v382_v28 = vadd.f32 %v374_v26, %v310_v22  ;;  %v1042_v22 = vld [vmem:[%s1382_s3 + $0x28] sm:$0xff]  }
  0xd9   :  { %v381_v27 = vadd.f32 %v373_v25, %v309_v21  ;;  %v256_v57 = vpop.permute.xlu1 %255 }
  0xda   :  { %v254_v33 = vpop.permute.xlu0 %253  ;;  %v304_v56 = vmul.f32 %v295_v50, %v256_v57  ;;  %v387_v50 = vld [vmem:[%s1383_s4 + $0x10] sm:$0xff]  ;;  %v1044_v57 = vld [vmem:[%s1382_s3 + $0x38] sm:$0xff]  }
  0xdb   :  { %v303_v13 = vmul.f32 %v290_v49, %v254_v33  ;;  %v1006_v14 = vpack.i.bf16 %v382_v28, %v381_v27  ;;  %v443_v23 = vpack.c.bf16 %v382_v28, %v381_v27  ;;  %v1045_v49 = vld [vmem:[%s1382_s3 + $0x50] sm:$0xff]  }
  0xdc   :  { %v312_v61 = vadd.f32 %v304_v56, %v240_v20  ;;  %v1043_v27 = vld [vmem:[%s1382_s3 + $0x30] sm:$0xff]   ;;  %v1046_v56 = vld [vmem:[%s1382_s3 + $0x58] sm:$0xff]  }
  0xdd   :  { %1007 = vrot.lane.b32.xlu0 %v1006_v14, %s1075_s30  ;;  %911 = vmatprep.subr.bf16.mxu1 %v443_v23  ;;  %v328_v34 = vpop.permute.xlu1 %327  ;;  %v311_v35 = vadd.f32 %v303_v13, %v239_v19  ;;  %v1047_v13 = vld [vmem:[%s1382_s3 + $0x40] sm:$0xff]  }
  0xde   :  { %v326_v24 = vpop.permute.xlu0 %325  ;;  %912 = vmatpush3.bf16.msra.mxu1 %v443_v23  ;;  %v376_v37 = vmul.f32 %v367_v8, %v328_v34 }
  0xdf   :  { %v375_v36 = vmul.f32 %v362_v7, %v326_v24 }
  0xe0   :  { %v384_v39 = vadd.f32 %v376_v37, %v312_v61 }
  0xe1   :  { %v383_v38 = vadd.f32 %v375_v36, %v311_v35  ;;  %1017 = vrot.lane.b32.xlu0 %v1281_v31, %s1076_s14  ;;  %v1039_v31 = vld [vmem:[%s1382_s3 + $0x10] sm:$0xff]  }
  0xe3   :  { %v1011_v40 = vpack.i.bf16 %v384_v39, %v383_v38  ;;  %v444_v41 = vpack.c.bf16 %v384_v39, %v383_v38 }
  0xe5   :  { %1027 = vrot.lane.b32.xlu0 %v1006_v14, %s1076_s14  ;;  %1012 = vrot.lane.b32.xlu1 %v1011_v40, %s1075_s30  ;;  %v1048_v14 = vld [vmem:[%s1382_s3 + $0x48] sm:$0xff]   ;;  %s1077_s3 = smov [#allocation2]  }
  0xe6   :  { %913 = vmatprep.subr.bf16.mxu1 %v444_v41  ;;  %s832_s19 = sshll.u32 %s1077_s3, 4  ;;  %s833_s19 = int_to_ptr.vmem [resolvable:$true] %s832_s19 }
  0xe7   :  { %914 = vmatpush3.bf16.msra.mxu1 %v444_v41  ;;  %s1049_s20 = scalar_lea.vmem %s833_s19, 1024  ;;  %p1054_p1 = scmp.lt.s32.totalorder %s833_s19, %s833_s19 }
  0xe8   :  { %p1050_p0 = scmp.ne.s32.totalorder %s833_s19, %s1049_s20  ;;  %p1055_p2 = scmp.lt.s32.totalorder %s1049_s20, %s1049_s20 }
  0xe9   :  { %415 = vperm.xlu0 %994, %v389_v32   ;;  %1022 = vrot.lane.b32.xlu1 %v1001_v18, %s1076_s14 }
  0xea   :  { %916 = vmatmul.mubr.msk.bf16.vlgmr.msra.gmra.mrb[0].mxu1 %vm465_vm0, %v1038_v42  ;;  %p1056_p3 = por %p1055_p2, %p1054_p1 }
  0xeb   :  { %919 = vmatprep.mubr.msk.bf16.mxu1 %vm465_vm0, %v1039_v31 }
  0xec   :  { %p1057_p4 = pnand %p1056_p3, %p1050_p0 }
  0xed   :  { %425 = vperm.xlu0 %994, %v391_v45   ;;  %1032 = vrot.lane.b32.xlu1 %v1011_v40, %s1076_s14 }
  0xf1   :  { %395 = vperm.xlu0 %994, %v385_v46   ;;  %420 = vperm.xlu1 %995, %v390_v47  }
  0xf2   :  { %920 = vmatmul.mubr.msk.bf16.gmra.mrb[4].mxu1 %vm465_vm0, %v1040_v48 }
  0xf3   :  { %951 = vmatprep.mubr.msk.bf16.mxu1 %vm465_vm0, %v1045_v49 }
  0xf5   :  { %405 = vperm.xlu0 %994, %v387_v50   ;;  %430 = vperm.xlu1 %995, %v392_v51  }
  0xf9   :  { %400 = vperm.xlu1 %995, %v386_v52  }
  0xfd   :  { %410 = vperm.xlu1 %995, %v388_v53  }
 0x12b   :  { %v998_v54 = vpop.permute.xlu0 %997 }
 0x12c   :  { %v1000_v55 = vunpack.i.h.bf16 %v998_v54  ;;  %v999_v58 = vunpack.i.l.bf16 %v998_v54 }
 0x12e   :  { %v576_v59 = vpack.c.bf16 %v1000_v55, %v999_v58 }
 0x130   :  { %923 = vmatprep.subr.bf16.mxu0 %v576_v59 }
 0x131   :  { %924 = vmatpush3.bf16.msra.mxu0 %v576_v59 }
 0x143   :  { %v1003_v62 = vpop.permute.xlu1 %1002 }
 0x144   :  { %v1005_v63 = vunpack.i.h.bf16 %v1003_v62  ;;  %v1004_v0 = vunpack.i.l.bf16 %v1003_v62 }
 0x146   :  { %v577_v1 = vpack.c.bf16 %v1005_v63, %v1004_v0 }
 0x148   :  { %925 = vmatprep.subr.bf16.mxu0 %v577_v1 }
 0x149   :  { %926 = vmatpush3.bf16.msra.mxu0 %v577_v1 }
 0x14f   :  { %v1008_v2 = vpop.permute.xlu0 %1007 }
 0x150   :  { %v1010_v3 = vunpack.i.h.bf16 %v1008_v2  ;;  %v1009_v4 = vunpack.i.l.bf16 %v1008_v2 }
 0x152   :  { %v578_v7 = vpack.c.bf16 %v1010_v3, %v1009_v4 }
 0x153   :  { %v1018_v8 = vpop.permute.xlu0 %1017 }
 0x154   :  { %v1020_v17 = vunpack.i.h.bf16 %v1018_v8  ;;  %v1019_v18 = vunpack.i.l.bf16 %v1018_v8  ;;  %927 = vmatprep.subr.bf16.mxu0 %v578_v7 }
 0x155   :  { %928 = vmatpush3.bf16.msra.mxu0 %v578_v7 }
 0x156   :  { %v710_v43 = vpack.c.bf16 %v1020_v17, %v1019_v18 }
 0x157   :  { %v1013_v44 = vpop.permute.xlu1 %1012  ;;  %v1028_v9 = vpop.permute.xlu0 %1027 }
 0x158   :  { %v1015_v5 = vunpack.i.h.bf16 %v1013_v44  ;;  %v1014_v6 = vunpack.i.l.bf16 %v1013_v44  ;;  %955 = vmatprep.subr.bf16.mxu1 %v710_v43  ;;  %v1030_v12 = vunpack.i.h.bf16 %v1028_v9  ;;  %v1029_v15 = vunpack.i.l.bf16 %v1028_v9 }
 0x159   :  { %959 = vmatpush3.bf16.msra.mxu1 %v710_v43 }
 0x15a   :  { %v579_v10 = vpack.c.bf16 %v1015_v5, %v1014_v6  ;;  %v712_v28 = vpack.c.bf16 %v1030_v12, %v1029_v15 }
 0x15b   :  { %v1023_v11 = vpop.permute.xlu1 %1022 }
 0x15c   :  { %v1025_v16 = vunpack.i.h.bf16 %v1023_v11  ;;  %v1024_v21 = vunpack.i.l.bf16 %v1023_v11  ;;  %929 = vmatprep.subr.bf16.mxu0 %v579_v10 }
 0x15d   :  { %930 = vmatpush3.bf16.msra.mxu0 %v579_v10 }
 0x15e   :  { %v711_v25 = vpack.c.bf16 %v1025_v16, %v1024_v21  ;;  %939 = vmatprep.subr.bf16.mxu0 %v710_v43 }
 0x15f   :  { %v1033_v26 = vpop.permute.xlu1 %1032 }
 0x160   :  { %v1035_v29 = vunpack.i.h.bf16 %v1033_v26  ;;  %v1034_v30 = vunpack.i.l.bf16 %v1033_v26  ;;  %932 = vmatmul.mubr.msk.bf16.vlgmr.msra.gmra.mrb[0].mxu0 %vm465_vm0, %v1042_v22  ;;  %956 = vmatprep.subr.bf16.mxu1 %v711_v25 }
 0x161   :  { %940 = vmatpush3.bf16.msra.mxu0 %v710_v43  ;;  %960 = vmatpush3.bf16.msra.mxu1 %v711_v25 }
 0x162   :  { %941 = vmatprep.subr.bf16.mxu0 %v711_v25  ;;  %957 = vmatprep.subr.bf16.mxu1 %v712_v28  ;;  %v713_v33 = vpack.c.bf16 %v1035_v29, %v1034_v30 }
 0x163   :  { %935 = vmatprep.mubr.msk.bf16.mxu0 %vm465_vm0, %v1043_v27 }
 0x165   :  { %942 = vmatpush3.bf16.msra.mxu0 %v711_v25  ;;  %961 = vmatpush3.bf16.msra.mxu1 %v712_v28 }
 0x166   :  { %943 = vmatprep.subr.bf16.mxu0 %v712_v28  ;;  %958 = vmatprep.subr.bf16.mxu1 %v713_v33 }
 0x168   :  { %936 = vmatmul.mubr.msk.bf16.gmra.mrb[4].mxu0 %vm465_vm0, %v1044_v57  ;;  %v416_v36 = vpop.permute.xlu0 %415 }
 0x169   :  { %944 = vmatpush3.bf16.msra.mxu0 %v712_v28  ;;  %962 = vmatpush3.bf16.msra.mxu1 %v713_v33 }
 0x16a   :  { %945 = vmatprep.subr.bf16.mxu0 %v713_v33  ;;  %947 = vmatprep.mubr.msk.bf16.mxu0 %vm465_vm0, %v1047_v13 }
 0x16c   :  { %952 = vmatmul.mubr.msk.bf16.vlgmr.msra.gmra.mrb[8].mxu1 %vm465_vm0, %v1046_v56  ;;  %v426_v38 = vpop.permute.xlu0 %425 }
 0x16d   :  { %946 = vmatpush3.bf16.msra.mxu0 %v713_v33 }
 0x170   :  { %948 = vmatmul.mubr.msk.bf16.vlgmr.msra.gmra.mrb[0].mxu0 %vm465_vm0, %v1048_v14  ;;  %v421_v37 = vpop.permute.xlu1 %420  ;;  %v396_v41 = vpop.permute.xlu0 %395 }
 0x174   :  { %v431_v39 = vpop.permute.xlu1 %430  ;;  %v406_v59 = vpop.permute.xlu0 %405 }
 0x178   :  { %v401_v47 = vpop.permute.xlu1 %400 }
 0x17c   :  { %v411_v3 = vpop.permute.xlu1 %410 }
 0x1bd   :  { %v917_v23 = vpop.f32.mrb[0].mxu1 }
 0x1be   :  { %v512_v19 = vpop.f32.mrb[1].mxu1  ;;  %v545_v0 = vadd.f32 %v917_v23, %v406_v59 }
 0x1bf   :  { %v918_v20 = vpop.f32.mrb[2].mxu1  ;;  %v543_v4 = vadd.f32 %v512_v19, %v396_v41 }
 0x1c0   :  { %v515_v24 = vpop.f32.mrb[3].mxu1  ;;  %v546_v17 = vadd.f32 %v918_v20, %v411_v3 }
 0x1c1   :  { %v544_v44 = vadd.f32 %v515_v24, %v401_v47 }
 0x1c5   :  { %v921_v34 = vpop.f32.mrb[4].mxu1 }
 0x1c6   :  { %v528_v60 = vpop.f32.mrb[5].mxu1  ;;  %v549_v40 = vadd.f32 %v921_v34, %v426_v38 }
 0x1c7   :  { %v922_v35 = vpop.f32.mrb[6].mxu1  ;;  %v547_v32 = vadd.f32 %v528_v60, %v416_v36 }
 0x1c8   :  { %v531_v61 = vpop.f32.mrb[7].mxu1  ;;  %v550_v31 = vadd.f32 %v922_v35, %v431_v39 }
 0x1c9   :  { %v548_v48 = vadd.f32 %v531_v61, %v421_v37 }
 0x23b   :  { %v937_v42 = vpop.f32.mrb[4].mxu0 }
 0x23c   :  { %v683_v45 = vadd.f32 %v937_v42, %v549_v40  ;;  %v662_v46 = vpop.f32.mrb[5].mxu0 }
 0x23d   :  { %v681_v49 = vadd.f32 %v662_v46, %v547_v32  ;;  %v938_v50 = vpop.f32.mrb[6].mxu0 }
 0x23e   :  { %v684_v51 = vadd.f32 %v938_v50, %v550_v31  ;;  %v665_v52 = vpop.f32.mrb[7].mxu0 }
 0x23f   :  { %v682_v53 = vadd.f32 %v665_v52, %v548_v48  ;;  %v953_v54 = vpop.f32.mrb[8].mxu1 }
 0x240   :  { %v817_v55 = vadd.f32 %v953_v54, %v683_v45  ;;  %v796_v58 = vpop.f32.mrb[9].mxu1 }
 0x241   :  { %v815_v62 = vadd.f32 %v796_v58, %v681_v49  ;;  %v954_v63 = vpop.f32.mrb[10].mxu1 }
 0x242   :  { %825 = vst [vmem:[#allocation2 + $0x30] sm:$0xff] %v817_v55  ;;  %v818_v1 = vadd.f32 %v954_v63, %v684_v51  ;;  %v799_v2 = vpop.f32.mrb[11].mxu1 }
 0x243   :  { %823 = vst [vmem:[#allocation2 + $0x20] sm:$0xff] %v815_v62  ;;  %v816_v7 = vadd.f32 %v799_v2, %v682_v53  ;;  %v949_v8 = vpop.f32.mrb[0].mxu0 }
 0x244   :  { %826 = vst [vmem:[#allocation2 + $0x38] sm:$0xff] %v818_v1  ;;  %v964_v18 = vadd.f32 %v949_v8, %v545_v0  ;;  %v780_v43 = vpop.f32.mrb[1].mxu0 }
 0x245   :  { %824 = vst [vmem:[#allocation2 + $0x28] sm:$0xff] %v816_v7  ;;  %v966_v5 = vadd.f32 %v780_v43, %v543_v4  ;;  %v950_v6 = vpop.f32.mrb[2].mxu0 }
 0x246   :  { %821 = vst [vmem:[#allocation2 + $0x10] sm:$0xff] %v964_v18  ;;  %v968_v9 = vadd.f32 %v950_v6, %v546_v17  ;;  %v783_v10 = vpop.f32.mrb[3].mxu0 }
 0x247   :  { %819 = vst [vmem:[#allocation2] sm:$0xff] %v966_v5  ;;  %v970_v11 = vadd.f32 %v783_v10, %v544_v44 }
 0x248   :  { %822 = vst [vmem:[#allocation2 + $0x18] sm:$0xff] %v968_v9 }
 0x249   :  { %820 = vst [vmem:[#allocation2 + $0x8] sm:$0xff] %v970_v11 }
 0x24a   :  { %1060 = shalt.err (!%p1057_p4)
}
 0x24b   :  { %s1061_s23 = scalar_lea.hbm %s1384_s5, 1024 }
 0x24c   :  { %p1062_p5 = scmp.ne.s32.totalorder %s1384_s5, %s1061_s23  ;;  %p1065_p6 = scmp.lt.u32.totalorder %s1061_s23, %s1384_s5 }
 0x24e   :  { %p1067_p7 = pnand %p1065_p6, %p1062_p5 }
 0x250   :  { %1070 = shalt.err (!%p1067_p7)
}
 0x251   :  { %s1078_s14 = smov 128   ;;  %s1079_s27 = smov 8  }
 0x252   :  { %838 = dma.vmem_to_hbm [thread:$0]  %s833_s19, 1024, %s1384_s5, [#allocation3], %s1078_s14, %s1078_s14, %s1079_s27  }
 0x253   :  { %1071 = dma.done.wait [#allocation3], 1024  }
 0x254   :  { %1072 = vsyncadd [#allocation3], 4294966272 }
 0x255   :  { %842 = vsyncpa [#allocation3], 1 }

</bundles_post_ra>
